<compile_context>
chip_gen: v7x
topology: tpu7x:2x2x1
jax: 0.10.0
libtpu: 0.0.40
codegen_flags: <defaults>
</compile_context>

<pallas_src>
import math

import jax
import jax.numpy as jnp
from jax.experimental import pallas as pl
from jax.experimental.pallas import tpu as pltpu


def _round_up(x, m):
    return ((x + m - 1) // m) * m


def _cdiv(a, b):
    return (a + b - 1) // b


def _pick_pack(num_pixels, num_hidden):
    """Smallest P with P*num_pixels % 128 == 0, bumped so P*H fills 128 lanes."""
    p = 128 // math.gcd(num_pixels, 128)
    while p * num_hidden < 128:
        p *= 2
    return p


def _block_diag_repeat(w, p):
    """(din, dout) -> (p*din, p*dout) block-diagonal with p copies of w."""
    din, dout = w.shape
    eye = jnp.eye(p, dtype=w.dtype)
    blk = eye[:, :, None, None] * w[None, None, :, :]        # (p, p, din, dout)
    return blk.transpose(0, 2, 1, 3).reshape(p * din, p * dout)


def _dec_digit_kernel(x_ref, w1_ref, b1_ref, w2_ref, b2_ref, w3_ref, b3_ref,
                      o_ref):
    """Fused 3-layer MLP + sigmoid over one (TM, P*Dz) tile of packed rows.

    Matmuls run in bf16 on the MXU with f32 accumulation; bias add, ReLU and
    sigmoid stay in f32 (VPU/EUP).  The output tile is lane-dense
    (P*num_pixels, a multiple of 128 columns) so stores are unmasked vst.
    """
    x = x_ref[...]                                                  # (TM, P*Dz) bf16
    h1 = jnp.dot(x, w1_ref[...],
                 preferred_element_type=jnp.float32) + b1_ref[...]  # (TM, P*H/2) f32
    h1 = jnp.maximum(h1, 0.0)                                       # ReLU
    h2 = jnp.dot(h1.astype(w2_ref.dtype), w2_ref[...],
                 preferred_element_type=jnp.float32) + b2_ref[...]  # (TM, P*H) f32
    h2 = jnp.maximum(h2, 0.0)                                       # ReLU
    logits = jnp.dot(h2.astype(w3_ref.dtype), w3_ref[...],
                     preferred_element_type=jnp.float32) + b3_ref[...]
    o_ref[...] = jax.nn.sigmoid(logits).astype(o_ref.dtype)         # (TM, P*NP)


def dec_digit_mlp(x, kparams, *, tm_max=2048, out_dtype=jnp.float32):
    """x: (N, Dz) bf16 -> (N, num_pixels) out_dtype via a Pallas MLP kernel."""
    p = kparams["p"]
    w1, b1 = kparams["w1"], kparams["b1"]
    w2, b2 = kparams["w2"], kparams["b2"]
    w3, b3 = kparams["w3"], kparams["b3"]

    n, dz = x.shape
    out_cols = w3.shape[1]                 # P * num_pixels, multiple of 128
    num_pixels = out_cols // p

    # --- pack P logical rows per kernel row (row-major reshape is free) -----
    n_src = _round_up(n, p)
    if n_src != n:
        x = jnp.pad(x, ((0, n_src - n), (0, 0)))
    n_rows = n_src // p
    xp = x.reshape(n_rows, p * dz)

    # --- tile selection: bound row padding by ~8 and keep >=2 grid steps ----
    num_steps = _cdiv(n_rows, tm_max)
    if num_steps < 2 and (n_rows // 8) >= 2:
        num_steps = 2                      # let v7x megacore use both TCs
    tm = _round_up(_cdiv(n_rows, num_steps), 8)
    grid_steps = _cdiv(n_rows, tm)
    n_pad = grid_steps * tm
    if n_pad != n_rows:
        xp = jnp.pad(xp, ((0, n_pad - n_rows), (0, 0)))

    const = lambda shape: pl.BlockSpec(shape, lambda i: (0, 0))  # VMEM-resident

    # Advisory cost estimate: memory-bound, dominated by the output stream.
    h_half = w1.shape[1] // p
    num_hidden = w2.shape[1] // p
    flops = 2 * n * (dz * h_half + h_half * num_hidden + num_hidden * num_pixels)
    bytes_accessed = (xp.size * xp.dtype.itemsize
                      + n_pad * out_cols * jnp.dtype(out_dtype).itemsize
                      + sum(a.size * a.dtype.itemsize
                            for a in (w1, b1, w2, b2, w3, b3)))
    ce = pl.CostEstimate(flops=flops,
                         transcendentals=n * num_pixels,
                         bytes_accessed=bytes_accessed)

    out = pl.pallas_call(
        _dec_digit_kernel,
        out_shape=jax.ShapeDtypeStruct((n_pad, out_cols), out_dtype),
        grid=(grid_steps,),
        in_specs=[
            pl.BlockSpec((tm, p * dz), lambda i: (i, 0)),   # streamed row tile
            const(w1.shape), const(b1.shape),
            const(w2.shape), const(b2.shape),
            const(w3.shape), const(b3.shape),
        ],
        out_specs=pl.BlockSpec((tm, out_cols), lambda i: (i, 0)),
        compiler_params=pltpu.CompilerParams(
            dimension_semantics=("parallel",)),
        cost_estimate=ce,
    )(xp, w1, b1, w2, b2, w3, b3)

    # Unpack: (n_pad, P*NP) -> (n_src, NP) -> (n, NP).  No lane slicing needed.
    return out[:n_rows].reshape(n_src, num_pixels)[:n]


def dec_digit_forward(z_what, kparams, num_pixels, *, tm_max=2048,
                      out_dtype=jnp.float32):
    """Equivalent of Dec_digit.forward(frames=None, z_what, z_where=None).

    Returns digit_mean with shape (S, B, K, DP, DP).
    """
    S, B, K, Dz = z_what.shape
    DP = int(math.sqrt(num_pixels))
    assert DP * DP == num_pixels, "num_pixels must be a perfect square"
    x = z_what.reshape(S * B * K, Dz).astype(jnp.bfloat16)
    flat = dec_digit_mlp(x, kparams, tm_max=tm_max, out_dtype=out_dtype)
    return flat.reshape(S, B, K, DP, DP)


def init_params(key, z_what_dim, num_hidden, num_pixels):
    """Deterministic synthetic parameters (same shapes as the nn.Sequential)."""
    h_half = int(0.5 * num_hidden)
    k1, k2, k3 = jax.random.split(key, 3)
    # weights stored (in, out) so the kernel does x @ W + b
    w1 = jax.random.normal(k1, (z_what_dim, h_half), jnp.float32) / math.sqrt(z_what_dim)
    b1 = jnp.zeros((1, h_half), jnp.float32)
    w2 = jax.random.normal(k2, (h_half, num_hidden), jnp.float32) / math.sqrt(h_half)
    b2 = jnp.zeros((1, num_hidden), jnp.float32)
    w3 = jax.random.normal(k3, (num_hidden, num_pixels), jnp.float32) / math.sqrt(num_hidden)
    b3 = jnp.zeros((1, num_pixels), jnp.float32)
    return (w1, b1, w2, b2, w3, b3)


def prepare_params(params_f32):
    """Cast weights to bf16 and expand them to P-way block-diagonal form.

    Biases stay f32 and are tiled P times.  P is chosen so that the packed
    output row (P * num_pixels) is an exact multiple of 128 lanes.
    """
    w1, b1, w2, b2, w3, b3 = params_f32
    num_hidden, num_pixels = w3.shape
    p = _pick_pack(num_pixels, num_hidden)
    bd = lambda w: _block_diag_repeat(w.astype(jnp.bfloat16), p)
    tile = lambda b: jnp.tile(b.astype(jnp.float32), (1, p))
    return {
        "p": p,
        "w1": bd(w1), "b1": tile(b1),
        "w2": bd(w2), "b2": tile(b2),
        "w3": bd(w3), "b3": tile(b3),
    }


def _reference_bf16_path(z_what, params_f32, num_pixels):
    """Pure-JAX reference matching the kernel's bf16-matmul / f32-accum math."""
    w1, b1, w2, b2, w3, b3 = params_f32
    S, B, K, Dz = z_what.shape
    DP = int(math.sqrt(num_pixels))
    x = z_what.reshape(S * B * K, Dz).astype(jnp.bfloat16)
    h1 = jnp.maximum(jnp.dot(x, w1.astype(jnp.bfloat16),
                             preferred_element_type=jnp.float32) + b1, 0.0)
    h2 = jnp.maximum(jnp.dot(h1.astype(jnp.bfloat16), w2.astype(jnp.bfloat16),
                             preferred_element_type=jnp.float32) + b2, 0.0)
    logits = jnp.dot(h2.astype(jnp.bfloat16), w3.astype(jnp.bfloat16),
                     preferred_element_type=jnp.float32) + b3
    return jax.nn.sigmoid(logits).reshape(S, B, K, DP, DP)


def _reference_f32(z_what, params_f32, num_pixels):
    """Full-precision reference (module semantics)."""
    w1, b1, w2, b2, w3, b3 = params_f32
    S, B, K, Dz = z_what.shape
    DP = int(math.sqrt(num_pixels))
    x = z_what.reshape(S * B * K, Dz)
    h1 = jnp.maximum(x @ w1 + b1, 0.0)
    h2 = jnp.maximum(h1 @ w2 + b2, 0.0)
    out = jax.nn.sigmoid(h2 @ w3 + b3)
    return out.reshape(S, B, K, DP, DP)


def _check_case(S, B, K, z_what_dim, num_hidden, num_pixels, seed):
    DP = int(math.sqrt(num_pixels))
    key = jax.random.PRNGKey(seed)
    k_param, k_z = jax.random.split(key)
    params_f32 = init_params(k_param, z_what_dim, num_hidden, num_pixels)
    kparams = prepare_params(params_f32)
    z_what = jax.random.normal(k_z, (S, B, K, z_what_dim), jnp.float32)

    digit_mean = dec_digit_forward(z_what, kparams, num_pixels)
    digit_mean = jax.block_until_ready(digit_mean)
    assert digit_mean.shape == (S, B, K, DP, DP), digit_mean.shape

    # Exactness check vs. a reference using the same bf16 weights / f32 accum.
    ref_bf16 = _reference_bf16_path(z_what, params_f32, num_pixels)
    assert jnp.allclose(digit_mean, ref_bf16, atol=1e-3, rtol=1e-3), (
        float(jnp.max(jnp.abs(digit_mean - ref_bf16))))

    # Loose semantic check vs. the full f32 module math (bf16 rounding only).
    ref_f32 = _reference_f32(z_what, params_f32, num_pixels)
    assert jnp.allclose(digit_mean, ref_f32, atol=1e-1), (
        float(jnp.max(jnp.abs(digit_mean - ref_f32))))


if __name__ == "__main__":
    # Small shapes consistent with the module: S samples, B batch, K digits.
    z_what_dim = 10
    num_hidden = 32
    num_pixels = 8 * 8

    # Case 1: tiny (single grid step, packed rows < one tile).
    _check_case(2, 2, 3, z_what_dim, num_hidden, num_pixels, seed=0)
    # Case 2: enough rows to exercise row padding and a >=2-step grid.
    _check_case(4, 4, 5, z_what_dim, num_hidden, num_pixels, seed=0)

    print("KERNEL_OK")
</pallas_src>

<mosaic_0001>
module attributes {stable_mosaic.version = 11 : i64} {
  func.func @_dec_digit_kernel(%arg0: i32, %arg1: memref<8x40xbf16, #tpu.memory_space<vmem>>, %arg2: memref<40x64xbf16, #tpu.memory_space<vmem>>, %arg3: memref<1x64xf32, #tpu.memory_space<vmem>>, %arg4: memref<64x128xbf16, #tpu.memory_space<vmem>>, %arg5: memref<1x128xf32, #tpu.memory_space<vmem>>, %arg6: memref<128x256xbf16, #tpu.memory_space<vmem>>, %arg7: memref<1x256xf32, #tpu.memory_space<vmem>>, %arg8: memref<8x256xf32, #tpu.memory_space<vmem>>) attributes {dimension_semantics = [#tpu.dimension_semantics<parallel>], iteration_bounds = array<i64: 1>, scalar_prefetch = 0 : i64, scratch_operands = 0 : i64, tpu.core_type = #tpu.core_type<tc>, window_params = [{transform_indices = @transform_0, window_bounds = array<i64: 8, 40>}, {pipeline_mode = #tpu.pipeline_mode<synchronous>, transform_indices = @transform_1, window_bounds = array<i64: 40, 64>}, {pipeline_mode = #tpu.pipeline_mode<synchronous>, transform_indices = @transform_2, window_bounds = array<i64: 1, 64>}, {pipeline_mode = #tpu.pipeline_mode<synchronous>, transform_indices = @transform_3, window_bounds = array<i64: 64, 128>}, {pipeline_mode = #tpu.pipeline_mode<synchronous>, transform_indices = @transform_4, window_bounds = array<i64: 1, 128>}, {pipeline_mode = #tpu.pipeline_mode<synchronous>, transform_indices = @transform_5, window_bounds = array<i64: 128, 256>}, {pipeline_mode = #tpu.pipeline_mode<synchronous>, transform_indices = @transform_6, window_bounds = array<i64: 1, 256>}, {transform_indices = @transform_7, window_bounds = array<i64: 8, 256>}]} {
    %c0 = arith.constant 0 : index
    %c0_0 = arith.constant 0 : index
    %0 = vector.load %arg1[%c0, %c0_0] : memref<8x40xbf16, #tpu.memory_space<vmem>>, vector<8x40xbf16>
    %c0_1 = arith.constant 0 : index
    %c0_2 = arith.constant 0 : index
    %1 = vector.load %arg2[%c0_1, %c0_2] : memref<40x64xbf16, #tpu.memory_space<vmem>>, vector<40x64xbf16>
    %cst = arith.constant dense<0.000000e+00> : vector<8x64xf32>
    %2 = tpu.matmul %0, %1, %cst {dimension_numbers = #tpu.dot_dimension_numbers<[1], [0], [0], [1], [0, 0, 1, 1], [], []>} : vector<8x40xbf16>, vector<40x64xbf16>, vector<8x64xf32> -> vector<8x64xf32>
    %c0_3 = arith.constant 0 : index
    %c0_4 = arith.constant 0 : index
    %3 = vector.load %arg3[%c0_3, %c0_4] : memref<1x64xf32, #tpu.memory_space<vmem>>, vector<1x64xf32>
    %4 = vector.broadcast %3 : vector<1x64xf32> to vector<8x64xf32>
    %5 = arith.addf %2, %4 : vector<8x64xf32>
    %cst_5 = arith.constant 0.000000e+00 : f32
    %6 = vector.broadcast %cst_5 : f32 to vector<8x64xf32>
    %7 = arith.maximumf %5, %6 : vector<8x64xf32>
    %8 = arith.truncf %7 : vector<8x64xf32> to vector<8x64xbf16>
    %c0_6 = arith.constant 0 : index
    %c0_7 = arith.constant 0 : index
    %9 = vector.load %arg4[%c0_6, %c0_7] : memref<64x128xbf16, #tpu.memory_space<vmem>>, vector<64x128xbf16>
    %cst_8 = arith.constant dense<0.000000e+00> : vector<8x128xf32>
    %10 = tpu.matmul %8, %9, %cst_8 {dimension_numbers = #tpu.dot_dimension_numbers<[1], [0], [0], [1], [0, 0, 1, 1], [], []>} : vector<8x64xbf16>, vector<64x128xbf16>, vector<8x128xf32> -> vector<8x128xf32>
    %c0_9 = arith.constant 0 : index
    %c0_10 = arith.constant 0 : index
    %11 = vector.load %arg5[%c0_9, %c0_10] : memref<1x128xf32, #tpu.memory_space<vmem>>, vector<1x128xf32>
    %12 = vector.broadcast %11 : vector<1x128xf32> to vector<8x128xf32>
    %13 = arith.addf %10, %12 : vector<8x128xf32>
    %cst_11 = arith.constant 0.000000e+00 : f32
    %14 = vector.broadcast %cst_11 : f32 to vector<8x128xf32>
    %15 = arith.maximumf %13, %14 : vector<8x128xf32>
    %16 = arith.truncf %15 : vector<8x128xf32> to vector<8x128xbf16>
    %c0_12 = arith.constant 0 : index
    %c0_13 = arith.constant 0 : index
    %17 = vector.load %arg6[%c0_12, %c0_13] : memref<128x256xbf16, #tpu.memory_space<vmem>>, vector<128x256xbf16>
    %cst_14 = arith.constant dense<0.000000e+00> : vector<8x256xf32>
    %18 = tpu.matmul %16, %17, %cst_14 {dimension_numbers = #tpu.dot_dimension_numbers<[1], [0], [0], [1], [0, 0, 1, 1], [], []>} : vector<8x128xbf16>, vector<128x256xbf16>, vector<8x256xf32> -> vector<8x256xf32>
    %c0_15 = arith.constant 0 : index
    %c0_16 = arith.constant 0 : index
    %19 = vector.load %arg7[%c0_15, %c0_16] : memref<1x256xf32, #tpu.memory_space<vmem>>, vector<1x256xf32>
    %20 = vector.broadcast %19 : vector<1x256xf32> to vector<8x256xf32>
    %21 = arith.addf %18, %20 : vector<8x256xf32>
    %22 = arith.negf %21 : vector<8x256xf32>
    %23 = math.exp %22 : vector<8x256xf32>
    %cst_17 = arith.constant 1.000000e+00 : f32
    %24 = vector.broadcast %cst_17 : f32 to vector<8x256xf32>
    %25 = arith.addf %24, %23 : vector<8x256xf32>
    %26 = arith.divf %24, %25 : vector<8x256xf32>
    %c0_18 = arith.constant 0 : index
    %c0_19 = arith.constant 0 : index
    %27 = vector.load %arg8[%c0_18, %c0_19] : memref<8x256xf32, #tpu.memory_space<vmem>>, vector<8x256xf32>
    tpu.vector_store %arg8[%c0_18, %c0_19], %26 {strides = array<i32>} : memref<8x256xf32, #tpu.memory_space<vmem>>, vector<8x256xf32>,
    return
  }
  func.func @transform_0(%arg0: i32) -> (i32, i32) {
    %c0_i32 = arith.constant 0 : i32
    %c0_i32_0 = arith.constant 0 : i32
    return %arg0, %c0_i32 : i32, i32
  }
  func.func @transform_1(%arg0: i32) -> (i32, i32) {
    %c0_i32 = arith.constant 0 : i32
    %c0_i32_0 = arith.constant 0 : i32
    %c0_i32_1 = arith.constant 0 : i32
    return %c0_i32, %c0_i32_0 : i32, i32
  }
  func.func @transform_2(%arg0: i32) -> (i32, i32) {
    %c0_i32 = arith.constant 0 : i32
    %c0_i32_0 = arith.constant 0 : i32
    %c0_i32_1 = arith.constant 0 : i32
    return %c0_i32, %c0_i32_0 : i32, i32
  }
  func.func @transform_3(%arg0: i32) -> (i32, i32) {
    %c0_i32 = arith.constant 0 : i32
    %c0_i32_0 = arith.constant 0 : i32
    %c0_i32_1 = arith.constant 0 : i32
    return %c0_i32, %c0_i32_0 : i32, i32
  }
  func.func @transform_4(%arg0: i32) -> (i32, i32) {
    %c0_i32 = arith.constant 0 : i32
    %c0_i32_0 = arith.constant 0 : i32
    %c0_i32_1 = arith.constant 0 : i32
    return %c0_i32, %c0_i32_0 : i32, i32
  }
  func.func @transform_5(%arg0: i32) -> (i32, i32) {
    %c0_i32 = arith.constant 0 : i32
    %c0_i32_0 = arith.constant 0 : i32
    %c0_i32_1 = arith.constant 0 : i32
    return %c0_i32, %c0_i32_0 : i32, i32
  }
  func.func @transform_6(%arg0: i32) -> (i32, i32) {
    %c0_i32 = arith.constant 0 : i32
    %c0_i32_0 = arith.constant 0 : i32
    %c0_i32_1 = arith.constant 0 : i32
    return %c0_i32, %c0_i32_0 : i32, i32
  }
  func.func @transform_7(%arg0: i32) -> (i32, i32) {
    %c0_i32 = arith.constant 0 : i32
    %c0_i32_0 = arith.constant 0 : i32
    return %arg0, %c0_i32 : i32, i32
  }
}

</mosaic_0001>

<bundles_post_ra>
// kernel: tpu_custom_call.1
= control target key start
LH: loop header
LB: loop body
LE: loop exit
PB: predicated region body
PF: predicated region fallthrough
CT: control target
= control target key end

     0   :  { %12 = vsyncpa [#allocation3], 0  ;;  %s782_s0 = inlined_call_operand.hbm [shape: bf16[8,40], index: 0, kind: input, shape index: {}]   ;;  %s783_s1 = inlined_call_operand.hbm [shape: bf16[40,64], index: 1, kind: input, shape index: {}]   ;;  %s784_s2 = inlined_call_operand.vmem [shape: f32[1,64], index: 2, kind: input, shape index: {}]   ;;  %s785_s3 = inlined_call_operand.hbm [shape: bf16[64,128], index: 3, kind: input, shape index: {}]   ;;  %s786_s4 = inlined_call_operand.vmem [shape: f32[1,128], index: 4, kind: input, shape index: {}]   ;;  %s787_s5 = inlined_call_operand.hbm [shape: bf16[128,256], index: 5, kind: input, shape index: {}]   ;;  %s788_s6 = inlined_call_operand.vmem [shape: f32[1,256], index: 6, kind: input, shape index: {}]   ;;  %s789_s7 = inlined_call_operand.hbm [shape: f32[8,256], index: 7, kind: output, shape index: {}]  }
   0x1   :  { %13 = vsyncpa [#allocation6], 0 }
   0x2   :  { %14 = vsyncpa [#allocation9], 0 }
   0x3   :  { %15 = vsyncpa [#allocation4], 0  ;;  %s653_s24 = smov [#allocation5]   ;;  %s535_s28 = scalar_lea.hbm %s783_s1, 320 }
   0x4   :  { %s31_s25 = sshll.u32 %s653_s24, 4  ;;  %p536_p0 = scmp.ne.s32.totalorder %s783_s1, %s535_s28  ;;  %s32_s25 = int_to_ptr.vmem [resolvable:$true] %s31_s25 }
   0x5   :  { %p539_p1 = scmp.lt.u32.totalorder %s535_s28, %s783_s1 }
   0x7   :  { %p541_p2 = pnand %p539_p1, %p536_p0 }
   0x9   :  { %544 = shalt.err (!%p541_p2)
}
   0xa   :  { %s545_s10 = scalar_lea.vmem %s32_s25, 320  ;;  %p550_p4 = scmp.lt.s32.totalorder %s32_s25, %s32_s25 }
   0xb   :  { %p546_p3 = scmp.ne.s32.totalorder %s32_s25, %s545_s10  ;;  %p551_p5 = scmp.lt.s32.totalorder %s545_s10, %s545_s10 }
   0xd   :  { %p552_p6 = por %p551_p5, %p550_p4 }
   0xf   :  { %p553_p7 = pnand %p552_p6, %p546_p3 }
  0x11   :  { %556 = shalt.err (!%p553_p7)
}
  0x12   :  { %s654_s11 = smov 64   ;;  %s655_s12 = smov 4  }
  0x13   :  { %37 = dma.hbm_to_vmem [thread:$0]  %s783_s1, 320, %s32_s25, [#allocation6], %s654_s11, %s654_s11, %s655_s12  }
  0x14   :  { %s656_s15 = smov [#allocation2]   ;;  %s657_s17 = smov [#allocation7]  }
  0x15   :  { %s22_s16 = sshll.u32 %s656_s15, 4  ;;  %s45_s18 = sshll.u32 %s657_s17, 4  ;;  %s23_s16 = int_to_ptr.vmem [resolvable:$true] %s22_s16  ;;  %s46_s18 = int_to_ptr.vmem [resolvable:$true] %s45_s18 }
  0x16   :  { %s557_s21 = scalar_lea.hbm %s782_s0, 64 }
  0x17   :  { %p558_p8 = scmp.ne.s32.totalorder %s782_s0, %s557_s21  ;;  %p561_p9 = scmp.lt.u32.totalorder %s557_s21, %s782_s0 }
  0x19   :  { %p563_p10 = pnand %p561_p9, %p558_p8 }
  0x1b   :  { %566 = shalt.err (!%p563_p10)
}
  0x1c   :  { %s567_s1 = scalar_lea.vmem %s23_s16, 64  ;;  %p572_p12 = scmp.lt.s32.totalorder %s23_s16, %s23_s16 }
  0x1d   :  { %p568_p11 = scmp.ne.s32.totalorder %s23_s16, %s567_s1  ;;  %p573_p13 = scmp.lt.s32.totalorder %s567_s1, %s567_s1 }
  0x1f   :  { %p574_p0 = por %p573_p13, %p572_p12 }
  0x21   :  { %p575_p1 = pnand %p574_p0, %p568_p11 }
  0x23   :  { %578 = shalt.err (!%p575_p1)
}
  0x24   :  { %25 = dma.hbm_to_vmem [thread:$0]  %s782_s0, 64, %s23_s16, [#allocation3]  }
  0x25   :  { %s579_s30 = scalar_lea.hbm %s785_s3, 512 }
  0x26   :  { %p580_p2 = scmp.ne.s32.totalorder %s785_s3, %s579_s30  ;;  %p583_p3 = scmp.lt.u32.totalorder %s579_s30, %s785_s3 }
  0x28   :  { %p585_p4 = pnand %p583_p3, %p580_p2 }
  0x2a   :  { %588 = shalt.err (!%p585_p4)
}
  0x2b   :  { %s589_s14 = scalar_lea.vmem %s46_s18, 512  ;;  %p594_p6 = scmp.lt.s32.totalorder %s46_s18, %s46_s18 }
  0x2c   :  { %p590_p5 = scmp.ne.s32.totalorder %s46_s18, %s589_s14  ;;  %p595_p7 = scmp.lt.s32.totalorder %s589_s14, %s589_s14 }
  0x2e   :  { %p596_p8 = por %p595_p7, %p594_p6 }
  0x30   :  { %p597_p9 = pnand %p596_p8, %p590_p5 }
  0x32   :  { %600 = shalt.err (!%p597_p9)
}
  0x33   :  { %51 = dma.hbm_to_vmem [thread:$0]  %s785_s3, 512, %s46_s18, [#allocation6], %s654_s11, %s654_s11, %s655_s12  }
  0x34   :  { %s658_s16 = smov [#allocation8]   ;;  %s601_s21 = scalar_lea.hbm %s787_s5, 2048 }
  0x35   :  { %s59_s17 = sshll.u32 %s658_s16, 4  ;;  %p602_p10 = scmp.ne.s32.totalorder %s787_s5, %s601_s21  ;;  %s60_s17 = int_to_ptr.vmem [resolvable:$true] %s59_s17 }
  0x36   :  { %p605_p11 = scmp.lt.u32.totalorder %s601_s21, %s787_s5 }
  0x38   :  { %p607_p12 = pnand %p605_p11, %p602_p10 }
  0x3a   :  { %610 = shalt.err (!%p607_p12)
}
  0x3b   :  { %s611_s1 = scalar_lea.vmem %s60_s17, 2048  ;;  %p616_p0 = scmp.lt.s32.totalorder %s60_s17, %s60_s17 }
  0x3c   :  { %p612_p13 = scmp.ne.s32.totalorder %s60_s17, %s611_s1  ;;  %p617_p1 = scmp.lt.s32.totalorder %s611_s1, %s611_s1 }
  0x3e   :  { %p618_p2 = por %p617_p1, %p616_p0 }
  0x40   :  { %p619_p3 = pnand %p618_p2, %p612_p13 }
  0x42   :  { %622 = shalt.err (!%p619_p3)
}
  0x43   :  { %s659_s3 = smov 128   ;;  %s660_s11 = smov 8  }
  0x44   :  { %65 = dma.hbm_to_vmem [thread:$0]  %s787_s5, 2048, %s60_s17, [#allocation9], %s659_s3, %s659_s3, %s660_s11  }
  0x45   :  { %645 = dma.done.wait [#allocation3], 64  }
  0x46   :  { %646 = vsyncadd [#allocation3], 4294967232 }
  0x47   :  { %647 = dma.done.wait [#allocation6], 832  }
  0x48   :  { %648 = vsyncadd [#allocation6], 4294966464 }
  0x49   :  { %649 = dma.done.wait [#allocation9], 2048  }
  0x4a   :  { %650 = vsyncadd [#allocation9], 4294965248  ;;  %v661_v0 = vmov 0.0   ;;  %vm662_vm0 = vmmov 0   ;;  %v496_v1 = vld [vmem:[#allocation5] sm:$0xff]   ;;  %v497_v2 = vld [vmem:[#allocation5 + $0x8] sm:$0xff]   ;;  %v262_v43 = vlaneseq }
  0x4b   :  { %462 = vmatprep.subr.bf16.mxu1 %v661_v0  ;;  %468 = vmatprep.mubr.msk.bf16.mxu1 %vm662_vm0, %v661_v0  ;;  %v498_v3 = vld [vmem:[#allocation5 + $0x10] ss:$0 sps:$4 sm:$0xff]   ;;  %vm113_vm1 = vcmask 1043456   ;;  %v81_v5 = vld [vmem:[#allocation2] sm:$0xf]  ;;  %v499_v6 = vld [vmem:[#allocation7] sm:$0xff]  }
  0x4c   :  { %463 = vmatpush3.bf16.msra.mxu1 %v496_v1  ;;  %v115_v4 = vsel %vm113_vm1, %v498_v3, 0  ;;  %vm109_vm2 = vcmask 326656   ;;  %v500_v7 = vld [vmem:[#allocation7 + $0x8] sm:$0xff]   ;;  %v501_v8 = vld [vmem:[#allocation7 + $0x10] sm:$0xff]   ;;  %v502_v9 = vld [vmem:[#allocation7 + $0x18] sm:$0xff]   ;;  %vm198_vm3 = vcmask 523264  }
  0x4d   :  { %464 = vmatprep.subr.bf16.mxu1 %v661_v0  ;;  %v503_v10 = vld [vmem:[#allocation8 + $0x4] ss:$8 sps:$4 sm:$0xff]   ;;  %v505_v11 = vld [vmem:[#allocation8] ss:$8 sps:$4 sm:$0xff]   ;;  %v506_v12 = vld [vmem:[#allocation8 + $0x14] ss:$8 sps:$4 sm:$0xff]  }
  0x4e   :  { %352 = vmatprep.subr.bf16.mxu0 %v503_v10  ;;  %v508_v13 = vld [vmem:[#allocation8 + $0x10] ss:$8 sps:$4 sm:$0xff]   ;;  %v509_v14 = vld [vmem:[#allocation8 + $0x24] ss:$8 sps:$4 sm:$0xff]   ;;  %v511_v15 = vld [vmem:[#allocation8 + $0x20] ss:$8 sps:$4 sm:$0xff]  }
  0x4f   :  { %353 = vmatpush1.bf16.msra.mxu0 %v505_v11  ;;  %v512_v16 = vld [vmem:[#allocation8 + $0x34] ss:$8 sps:$4 sm:$0xff]   ;;  %v514_v17 = vld [vmem:[#allocation8 + $0x30] ss:$8 sps:$4 sm:$0xff]   ;;  %v515_v18 = vld [vmem:[#allocation8 + $0x44] ss:$8 sps:$4 sm:$0xff]  }
  0x50   :  { %465 = vmatpush3.bf16.msra.mxu1 %v497_v2  ;;  %354 = vmatprep.subr.bf16.mxu0 %v506_v12  ;;  %v517_v19 = vld [vmem:[#allocation8 + $0x40] ss:$8 sps:$4 sm:$0xff]   ;;  %v518_v20 = vld [vmem:[#allocation8 + $0x54] ss:$8 sps:$4 sm:$0xff]   ;;  %v520_v21 = vld [vmem:[#allocation8 + $0x50] ss:$8 sps:$4 sm:$0xff]  }
  0x51   :  { %466 = vmatprep.subr.bf16.mxu1 %v661_v0  ;;  %v521_v22 = vld [vmem:[#allocation8 + $0x64] ss:$8 sps:$4 sm:$0xff]   ;;  %v424_v23 = vld [vmem:[%s784_s2] ss:$0 sm:$0xff]  ;;  %v524_v32 = vld [vmem:[#allocation8 + $0x74] ss:$8 sps:$4 sm:$0xff]  }
  0x52   :  { %v523_v31 = vld [vmem:[#allocation8 + $0x60] ss:$8 sps:$4 sm:$0xff]   ;;  %v526_v33 = vld [vmem:[#allocation8 + $0x70] ss:$8 sps:$4 sm:$0xff]   ;;  %v663_v34 = vmov 0   ;;  %v263_v44 = vshrl.u32 %v262_v43, 7 }
  0x53   :  { %355 = vmatpush1.bf16.msra.mxu0 %v508_v13  ;;  %384 = vmatprep.mubr.bf16.mxu0 %v663_v34  ;;  %v429_v35 = vld [vmem:[%s786_s4] ss:$0 sm:$0xff]  ;;  %s664_s4 = smov [#allocation10]  }
  0x54   :  { %467 = vmatpush3.bf16.msra.mxu1 %v115_v4  ;;  %356 = vmatprep.subr.bf16.mxu0 %v509_v14  ;;  %v264_v45 = vsub.s32 0, %v263_v44  ;;  %v260_v46 = vld [vmem:[%s788_s6] sm:$0x3]  ;;  %v268_v47 = vsub.s32 1, %v263_v44  ;;  %s413_s6 = sshll.u32 %s664_s4, 4  ;;  %s414_s6 = int_to_ptr.vmem [resolvable:$true] %s413_s6 }
  0x55   :  { %472 = vmatprep.subr.bf16.mxu1 %v661_v0  ;;  %s623_s30 = scalar_lea.vmem %s414_s6, 256  ;;  %p628_p5 = scmp.lt.s32.totalorder %s414_s6, %s414_s6 }
  0x56   :  { %v265_v48 = vrot.slane %v260_v46, %v264_v45  ;;  %v269_v49 = vrot.slane %v260_v46, %v268_v47  ;;  %p624_p4 = scmp.ne.s32.totalorder %s414_s6, %s623_s30  ;;  %p629_p6 = scmp.lt.s32.totalorder %s623_s30, %s623_s30 }
  0x57   :  { %469 = vmatmul.mubr.msk.bf16.vlgmr.msra.gmra.mrb[0].mxu1 %vm109_vm2, %v81_v5  ;;  %357 = vmatpush1.bf16.msra.mxu0 %v511_v15 }
  0x58   :  { %473 = vmatpush3.bf16.msra.mxu1 %v499_v6  ;;  %480 = vmatprep.mubr.msk.bf16.mxu1 %vm662_vm0, %v661_v0  ;;  %p630_p7 = por %p629_p6, %p628_p5 }
  0x59   :  { %474 = vmatprep.subr.bf16.mxu1 %v661_v0  ;;  %358 = vmatprep.subr.bf16.mxu0 %v512_v16 }
  0x5a   :  { %p631_p8 = pnand %p630_p7, %p624_p4 }
  0x5b   :  { %359 = vmatpush1.bf16.msra.mxu0 %v514_v17 }
  0x5c   :  { %475 = vmatpush3.bf16.msra.mxu1 %v500_v7  ;;  %360 = vmatprep.subr.bf16.mxu0 %v515_v18 }
  0x5d   :  { %476 = vmatprep.subr.bf16.mxu1 %v661_v0 }
  0x5f   :  { %361 = vmatpush1.bf16.msra.mxu0 %v517_v19 }
  0x60   :  { %477 = vmatpush3.bf16.msra.mxu1 %v501_v8  ;;  %362 = vmatprep.subr.bf16.mxu0 %v518_v20 }
  0x61   :  { %478 = vmatprep.subr.bf16.mxu1 %v661_v0 }
  0x63   :  { %363 = vmatpush1.bf16.msra.mxu0 %v520_v21 }
  0x64   :  { %479 = vmatpush3.bf16.msra.mxu1 %v502_v9  ;;  %364 = vmatprep.subr.bf16.mxu0 %v521_v22 }
  0x67   :  { %365 = vmatpush1.bf16.msra.mxu0 %v523_v31 }
  0x68   :  { %366 = vmatprep.subr.bf16.mxu0 %v524_v32 }
  0x6b   :  { %367 = vmatpush1.bf16.msra.mxu0 %v526_v33 }
 0x12a   :  { %v151_v24 = vpop.f32.mrb[0].mxu1 }
 0x12b   :  { %v152_v25 = vadd.f32 %v424_v23, %v151_v24  ;;  %v470_v26 = vpop.f32.mrb[1].mxu1 }
 0x12c   :  { %v154_v27 = vpop.f32.mrb[2].mxu1 }
 0x12d   :  { %v157_v28 = vmax.f32 %v152_v25, 0.0  ;;  %v471_v29 = vpop.f32.mrb[3].mxu1 }
 0x12f   :  { %v158_v30 = vpack.c.bf16 %v157_v28, %v157_v28 }
 0x131   :  { %481 = vmatmul.mubr.msk.bf16.vlgmr.msra.gmra.mrb[4].mxu1 %vm198_vm3, %v158_v30 }
 0x204   :  { %v236_v36 = vpop.f32.mrb[4].mxu1 }
 0x205   :  { %v237_v37 = vadd.f32 %v429_v35, %v236_v36  ;;  %v482_v38 = vpop.f32.mrb[5].mxu1 }
 0x206   :  { %v239_v39 = vpop.f32.mrb[6].mxu1 }
 0x207   :  { %v242_v40 = vmax.f32 %v237_v37, 0.0  ;;  %v483_v41 = vpop.f32.mrb[7].mxu1 }
 0x209   :  { %v243_v42 = vpack.c.bf16 %v242_v40, %v242_v40 }
 0x20b   :  { %385 = vmatmul.mubr.bf16.vlgmr.msra.gmra.mrb[0].mxu0 %v243_v42 }
 0x2de   :  { %v386_v50 = vpop.f32.mrb[0].mxu0 }
 0x2df   :  { %v387_v51 = vadd.f32 %v386_v50, %v265_v48  ;;  %v388_v52 = vpop.f32.mrb[1].mxu0 }
 0x2e0   :  { %v389_v53 = vadd.f32 %v388_v52, %v269_v49  ;;  %v390_v54 = vpop.f32.mrb[2].mxu0 }
 0x2e1   :  { %v451_v55 = vmul.f32 -1.442695, %v387_v51  ;;  %v391_v56 = vpop.f32.mrb[3].mxu0 }
 0x2e2   :  { %v452_v57 = vmul.f32 -1.442695, %v389_v53 }
 0x2e3   :  { %527 = vpow2.f32 %v451_v55 }
 0x2e4   :  { %529 = vpow2.f32 %v452_v57 }
 0x2ed   :  { %v528_v58 = vpop.eup %527 }
 0x2ee   :  { %v530_v59 = vpop.eup %529  ;;  %v399_v60 = vadd.f32 1.0, %v528_v58 }
 0x2ef   :  { %v400_v61 = vadd.f32 1.0, %v530_v59 }
 0x2f0   :  { %531 = vrcp.f32 %v399_v60 }
 0x2f1   :  { %533 = vrcp.f32 %v400_v61 }
 0x2fa   :  { %v532_v62 = vpop.eup %531 }
 0x2fb   :  { %v534_v63 = vpop.eup %533  ;;  %405 = vst [vmem:[#allocation10] sm:$0xff] %v532_v62 }
 0x2fc   :  { %406 = vst [vmem:[#allocation10 + $0x8] sm:$0xff] %v534_v63 }
 0x2fd   :  { %634 = shalt.err (!%p631_p8)
}
 0x2fe   :  { %s635_s10 = scalar_lea.hbm %s789_s7, 256 }
 0x2ff   :  { %p636_p9 = scmp.ne.s32.totalorder %s789_s7, %s635_s10  ;;  %p639_p10 = scmp.lt.u32.totalorder %s635_s10, %s789_s7 }
 0x301   :  { %p641_p11 = pnand %p639_p10, %p636_p9 }
 0x303   :  { %644 = shalt.err (!%p641_p11)
}
 0x304   :  { %416 = dma.vmem_to_hbm [thread:$0]  %s414_s6, 256, %s789_s7, [#allocation4]  }
 0x305   :  { %651 = dma.done.wait [#allocation4], 256  }
 0x306   :  { %652 = vsyncadd [#allocation4], 4294967040 }
 0x307   :  { %420 = vsyncpa [#allocation3], 1 }
 0x308   :  { %421 = vsyncpa [#allocation6], 1 }
 0x309   :  { %422 = vsyncpa [#allocation9], 1 }
 0x30a   :  { %423 = vsyncpa [#allocation4], 1 }

</bundles_post_ra>
